<compile_context>
chip_gen: v7x
topology: tpu7x:2x2x1
jax: 0.10.0
libtpu: 0.0.40
codegen_flags: <defaults>
</compile_context>

<pallas_src>
import jax
import jax.numpy as jnp
from jax.experimental import pallas as pl
from jax.experimental.pallas import tpu as pltpu


def _round_up(x, m):
    return (x + m - 1) // m * m


def _num_tensorcores(default=2):
    """Best-effort TensorCores-per-chip (v7x=2, v5e/v6e=1). Never raises."""
    try:
        info = pltpu.get_tpu_info()
        for name in ("num_cores", "core_count", "num_tensorcores",
                     "tensorcores_per_chip"):
            v = getattr(info, name, None)
            if isinstance(v, int) and v > 0:
                return v
    except Exception:
        pass
    return default


def _make_pff_kernel(x_dot_dtype=None):
    def kernel(x_ref, w1_ref, b1_ref, w2_ref, b2_ref, o_ref):
        # x_ref: (tm, in_p)      w1_ref: (in_p, hid_p)   b1_ref: (1, hid_p) f32
        # w2_ref: (hid_p, in_p)  b2_ref: (1, in_p) f32   o_ref: (tm, in_p)
        x = x_ref[...]
        if x_dot_dtype is not None and x.dtype != x_dot_dtype:
            x = x.astype(x_dot_dtype)            # e.g. f32 -> bf16 MXU inputs (v5e)
        # linear1 (+bias) with f32 accumulation on the MXU; ReLU in f32.
        h = jnp.dot(x, w1_ref[...], preferred_element_type=jnp.float32) + b1_ref[...]
        h = jnp.maximum(h, 0.0)                  # ReLU; dropout(p=0) == identity
        # Documented choice: hidden activations rounded to the weight dtype (bf16 when
        # streaming bf16) so the second dot runs at native MXU input precision.
        y = jnp.dot(h.astype(w2_ref.dtype), w2_ref[...],
                    preferred_element_type=jnp.float32) + b2_ref[...]
        o_ref[...] = y.astype(o_ref.dtype)       # dropout(p=0) == identity
    return kernel


def pff_pack_params(w1, b1, w2, b2, *, weights_dtype=None):
    """One-time (module-init) packing of weights/biases into lane-dense form.

    Folds `pack = 128 // inplanes` consecutive rows into one 128-lane row via
    block-diagonal (kron) weights, so every in-kernel DMA is a full-width unmasked
    vld/vst and the MXU sees K=128 / N=256 instead of K=32 / N=64.
    """
    inplanes, planes = w1.shape
    pack = 128 // inplanes if (inplanes < 128 and 128 % inplanes == 0) else 1
    # pack == 1 with inplanes < 128 would mean masked (<128-lane) stores: legal but slow.
    wd = w1.dtype if weights_dtype is None else weights_dtype
    w1p = jnp.kron(jnp.eye(pack, dtype=wd), w1.astype(wd))        # (in_p, hid_p)
    w2p = jnp.kron(jnp.eye(pack, dtype=wd), w2.astype(wd))        # (hid_p, in_p)
    b1p = jnp.tile(b1.astype(jnp.float32), pack).reshape(1, planes * pack)
    b2p = jnp.tile(b2.astype(jnp.float32), pack).reshape(1, inplanes * pack)
    return {"w1p": w1p, "b1p": b1p, "w2p": w2p, "b2p": b2p,
            "inplanes": inplanes, "planes": planes, "pack": pack}


def pff_block(x, params, *, block_rows=2048, num_cores=None, mxu_bf16=False):
    """relu(x @ w1 + b1) @ w2 + b2 over the last axis of x, using packed params.

    `params` comes from pff_pack_params (hoisted to module-init time).
    `block_rows` is the max row tile in *packed* (128-lane) rows; multiple of 16.
    `mxu_bf16=True` casts the x tile to bf16 before the first dot (pair with
    weights_dtype=jnp.bfloat16 in pff_pack_params) -- recommended on v5e for f32 x.
    """
    assert block_rows % 16 == 0, "block_rows must be a multiple of 16"
    inplanes = params["inplanes"]
    planes = params["planes"]
    pack = params["pack"]
    in_p = inplanes * pack           # packed input/output width  (128 here)
    hid_p = planes * pack            # packed hidden width        (256 here)
    assert x.shape[-1] == inplanes

    orig_shape = x.shape
    out_dtype = x.dtype
    itemsize = jnp.dtype(x.dtype).itemsize
    sub = 16 if itemsize == 2 else 8       # native sublane tile of the streamed dtype

    x2d = x.reshape(-1, inplanes)
    M = x2d.shape[0]

    # Pad only to a multiple of `pack` (<= pack-1 rows, negligible); the row grid
    # itself may be ragged -- Pallas masks the tail block's out-of-range stores.
    pad_rows = (-M) % pack
    if pad_rows:
        x2d = jnp.pad(x2d, ((0, pad_rows), (0, 0)))
    mp = (M + pad_rows) // pack
    xp = x2d.reshape(mp, in_p)       # contiguous row-major reshape: free in HBM

    # ---- row tiling (packed rows): >= 2 grid steps per TensorCore when M allows,
    # capped at block_rows; a single full-extent block for tiny inputs.
    if num_cores is None:
        num_cores = _num_tensorcores()
    target_steps = 2 * max(1, int(num_cores))
    tm = min(block_rows, _round_up(pl.cdiv(mp, target_steps), sub))
    if tm >= mp:
        tm = mp                      # one block == full array extent (always legal)
    grid_m = pl.cdiv(mp, tm)

    # Advisory cost hint (true, unpacked op counts).
    cost = pl.CostEstimate(
        flops=4 * M * inplanes * planes,
        transcendentals=0,
        bytes_accessed=(2 * M * inplanes * itemsize
                        + (params["w1p"].size + params["w2p"].size)
                        * jnp.dtype(params["w1p"].dtype).itemsize
                        + (params["b1p"].size + params["b2p"].size) * 4),
    )

    kernel = _make_pff_kernel(jnp.bfloat16 if mxu_bf16 else None)

    outp = pl.pallas_call(
        kernel,
        out_shape=jax.ShapeDtypeStruct((mp, in_p), out_dtype),
        grid_spec=pltpu.PrefetchScalarGridSpec(
            num_scalar_prefetch=0,
            grid=(grid_m,),
            in_specs=[
                pl.BlockSpec((tm, in_p), lambda i: (i, 0)),       # x tile (streamed)
                pl.BlockSpec((in_p, hid_p), lambda i: (0, 0)),    # w1 (resident)
                pl.BlockSpec((1, hid_p), lambda i: (0, 0)),       # b1 (resident, f32)
                pl.BlockSpec((hid_p, in_p), lambda i: (0, 0)),    # w2 (resident)
                pl.BlockSpec((1, in_p), lambda i: (0, 0)),        # b2 (resident, f32)
            ],
            out_specs=pl.BlockSpec((tm, in_p), lambda i: (i, 0)),  # lane-dense out
        ),
        compiler_params=pltpu.CompilerParams(
            dimension_semantics=("parallel",),
            vmem_limit_bytes=48 * 1024 * 1024,   # headroom above v5e's 16 MiB default,
        ),                                       # still under v7x's 64 MiB physical
        cost_estimate=cost,
    )(xp, params["w1p"], params["b1p"], params["w2p"], params["b2p"])

    out2d = outp.reshape(mp * pack, inplanes)
    if pad_rows:
        out2d = out2d[:M]
    return out2d.reshape(orig_shape)


def pff_reference(x, w1, b1, w2, b2):
    h = jnp.maximum(jnp.dot(x, w1) + b1, 0.0)
    return jnp.dot(h, w2) + b2


if __name__ == "__main__":
    # Module hyperparameters (synthetic, deterministic init).
    inplanes = 32   # in_features of linear1 / out_features of linear2
    planes = 64     # hidden width
    B, T = 2, 8     # batch, sequence length

    key = jax.random.PRNGKey(0)
    kx, kw1, kb1, kw2, kb2 = jax.random.split(key, 5)

    x = jax.random.normal(kx, (B, T, inplanes), dtype=jnp.float32)

    # PyTorch nn.Linear stores weight as (out, in); we keep (in, out) so the kernel
    # does x @ W directly. Deterministic uniform init like PyTorch's default.
    lim1 = 1.0 / (inplanes ** 0.5)
    w1 = jax.random.uniform(kw1, (inplanes, planes), minval=-lim1, maxval=lim1,
                            dtype=jnp.float32)
    b1 = jax.random.uniform(kb1, (planes,), minval=-lim1, maxval=lim1,
                            dtype=jnp.float32)
    lim2 = 1.0 / (planes ** 0.5)
    w2 = jax.random.uniform(kw2, (planes, inplanes), minval=-lim2, maxval=lim2,
                            dtype=jnp.float32)
    b2 = jax.random.uniform(kb2, (inplanes,), minval=-lim2, maxval=lim2,
                            dtype=jnp.float32)

    # Module-init-time packing (hoisted off the per-forward critical path).
    params_f32 = pff_pack_params(w1, b1, w2, b2)
    params_bf16 = pff_pack_params(w1, b1, w2, b2, weights_dtype=jnp.bfloat16)

    # --- 1) f32 path at the module's toy size (M = 16 rows -> one full-extent block).
    out = jax.block_until_ready(pff_block(x, params_f32))
    ref = pff_reference(x, w1, b1, w2, b2)
    assert out.shape == x.shape
    assert jnp.allclose(out, ref, atol=1e-5, rtol=1e-5), "f32 mismatch vs reference"

    # --- 2) bf16-streaming path at a more realistic size (memory-bound regime):
    #        M = 4096 rows -> multiple parallel grid steps of packed rows.
    xl = jax.random.normal(kx, (8, 512, inplanes), dtype=jnp.float32)
    out_bf16 = jax.block_until_ready(pff_block(xl.astype(jnp.bfloat16), params_bf16))
    ref_l = pff_reference(xl, w1, b1, w2, b2)
    assert out_bf16.shape == xl.shape
    max_err = jnp.max(jnp.abs(out_bf16.astype(jnp.float32) - ref_l))
    assert float(max_err) < 0.1, f"bf16 path error too large: {max_err}"

    # --- 3) v5e-style path: f32 activations, bf16 weights + bf16 MXU dots in-kernel.
    out_mxu = jax.block_until_ready(pff_block(xl, params_bf16, mxu_bf16=True))
    max_err2 = jnp.max(jnp.abs(out_mxu - ref_l))
    assert float(max_err2) < 0.1, f"mxu_bf16 path error too large: {max_err2}"

    # --- 4) ragged-M check: M = 1003 rows (not a multiple of pack or the row tile),
    #        exercising the pad-to-pack + ragged-tail-block path.
    xr = jax.random.normal(kx, (1003, inplanes), dtype=jnp.float32)
    out_r = jax.block_until_ready(pff_block(xr, params_f32))
    ref_r = pff_reference(xr, w1, b1, w2, b2)
    assert out_r.shape == xr.shape
    assert jnp.allclose(out_r, ref_r, atol=1e-5, rtol=1e-5), "ragged-M mismatch"

    print("KERNEL_OK")
</pallas_src>

<mosaic_0001>
module attributes {stable_mosaic.version = 11 : i64} {
  func.func @kernel(%arg0: i32, %arg1: memref<4x128xf32, #tpu.memory_space<vmem>>, %arg2: memref<128x256xf32, #tpu.memory_space<vmem>>, %arg3: memref<1x256xf32, #tpu.memory_space<vmem>>, %arg4: memref<256x128xf32, #tpu.memory_space<vmem>>, %arg5: memref<1x128xf32, #tpu.memory_space<vmem>>, %arg6: memref<4x128xf32, #tpu.memory_space<vmem>>) attributes {dimension_semantics = [#tpu.dimension_semantics<parallel>], iteration_bounds = array<i64: 1>, scalar_prefetch = 0 : i64, scratch_operands = 0 : i64, tpu.core_type = #tpu.core_type<tc>, window_params = [{transform_indices = @transform_0, window_bounds = array<i64: 4, 128>}, {pipeline_mode = #tpu.pipeline_mode<synchronous>, transform_indices = @transform_1, window_bounds = array<i64: 128, 256>}, {pipeline_mode = #tpu.pipeline_mode<synchronous>, transform_indices = @transform_2, window_bounds = array<i64: 1, 256>}, {pipeline_mode = #tpu.pipeline_mode<synchronous>, transform_indices = @transform_3, window_bounds = array<i64: 256, 128>}, {pipeline_mode = #tpu.pipeline_mode<synchronous>, transform_indices = @transform_4, window_bounds = array<i64: 1, 128>}, {transform_indices = @transform_5, window_bounds = array<i64: 4, 128>}]} {
    %c0 = arith.constant 0 : index
    %c0_0 = arith.constant 0 : index
    %0 = vector.load %arg1[%c0, %c0_0] : memref<4x128xf32, #tpu.memory_space<vmem>>, vector<4x128xf32>
    %c0_1 = arith.constant 0 : index
    %c0_2 = arith.constant 0 : index
    %1 = vector.load %arg2[%c0_1, %c0_2] : memref<128x256xf32, #tpu.memory_space<vmem>>, vector<128x256xf32>
    %cst = arith.constant dense<0.000000e+00> : vector<4x256xf32>
    %2 = tpu.matmul %0, %1, %cst {dimension_numbers = #tpu.dot_dimension_numbers<[1], [0], [0], [1], [0, 0, 1, 1], [], []>} : vector<4x128xf32>, vector<128x256xf32>, vector<4x256xf32> -> vector<4x256xf32>
    %c0_3 = arith.constant 0 : index
    %c0_4 = arith.constant 0 : index
    %3 = vector.load %arg3[%c0_3, %c0_4] : memref<1x256xf32, #tpu.memory_space<vmem>>, vector<1x256xf32>
    %4 = vector.broadcast %3 : vector<1x256xf32> to vector<4x256xf32>
    %5 = arith.addf %2, %4 : vector<4x256xf32>
    %cst_5 = arith.constant 0.000000e+00 : f32
    %6 = vector.broadcast %cst_5 : f32 to vector<4x256xf32>
    %7 = arith.maximumf %5, %6 : vector<4x256xf32>
    %c0_6 = arith.constant 0 : index
    %c0_7 = arith.constant 0 : index
    %8 = vector.load %arg4[%c0_6, %c0_7] : memref<256x128xf32, #tpu.memory_space<vmem>>, vector<256x128xf32>
    %cst_8 = arith.constant dense<0.000000e+00> : vector<4x128xf32>
    %9 = tpu.matmul %7, %8, %cst_8 {dimension_numbers = #tpu.dot_dimension_numbers<[1], [0], [0], [1], [0, 0, 1, 1], [], []>} : vector<4x256xf32>, vector<256x128xf32>, vector<4x128xf32> -> vector<4x128xf32>
    %c0_9 = arith.constant 0 : index
    %c0_10 = arith.constant 0 : index
    %10 = vector.load %arg5[%c0_9, %c0_10] : memref<1x128xf32, #tpu.memory_space<vmem>>, vector<1x128xf32>
    %11 = vector.broadcast %10 : vector<1x128xf32> to vector<4x128xf32>
    %12 = arith.addf %9, %11 : vector<4x128xf32>
    %c0_11 = arith.constant 0 : index
    %c0_12 = arith.constant 0 : index
    %13 = vector.load %arg6[%c0_11, %c0_12] : memref<4x128xf32, #tpu.memory_space<vmem>>, vector<4x128xf32>
    tpu.vector_store %arg6[%c0_11, %c0_12], %12 {strides = array<i32>} : memref<4x128xf32, #tpu.memory_space<vmem>>, vector<4x128xf32>,
    return
  }
  func.func @transform_0(%arg0: i32) -> (i32, i32) {
    %c0_i32 = arith.constant 0 : i32
    %c0_i32_0 = arith.constant 0 : i32
    return %arg0, %c0_i32 : i32, i32
  }
  func.func @transform_1(%arg0: i32) -> (i32, i32) {
    %c0_i32 = arith.constant 0 : i32
    %c0_i32_0 = arith.constant 0 : i32
    %c0_i32_1 = arith.constant 0 : i32
    return %c0_i32, %c0_i32_0 : i32, i32
  }
  func.func @transform_2(%arg0: i32) -> (i32, i32) {
    %c0_i32 = arith.constant 0 : i32
    %c0_i32_0 = arith.constant 0 : i32
    %c0_i32_1 = arith.constant 0 : i32
    return %c0_i32, %c0_i32_0 : i32, i32
  }
  func.func @transform_3(%arg0: i32) -> (i32, i32) {
    %c0_i32 = arith.constant 0 : i32
    %c0_i32_0 = arith.constant 0 : i32
    %c0_i32_1 = arith.constant 0 : i32
    return %c0_i32, %c0_i32_0 : i32, i32
  }
  func.func @transform_4(%arg0: i32) -> (i32, i32) {
    %c0_i32 = arith.constant 0 : i32
    %c0_i32_0 = arith.constant 0 : i32
    %c0_i32_1 = arith.constant 0 : i32
    return %c0_i32, %c0_i32_0 : i32, i32
  }
  func.func @transform_5(%arg0: i32) -> (i32, i32) {
    %c0_i32 = arith.constant 0 : i32
    %c0_i32_0 = arith.constant 0 : i32
    return %arg0, %c0_i32 : i32, i32
  }
}

</mosaic_0001>

<bundles_post_ra>
// kernel: tpu_custom_call.1
= control target key start
LH: loop header
LB: loop body
LE: loop exit
PB: predicated region body
PF: predicated region fallthrough
CT: control target
= control target key end

     0   :  { %10 = vsyncpa [#allocation3], 0  ;;  %s600_s0 = inlined_call_operand.hbm [shape: f32[4,128], index: 0, kind: input, shape index: {}]   ;;  %s601_s1 = inlined_call_operand.hbm [shape: f32[128,256], index: 1, kind: input, shape index: {}]   ;;  %s602_s2 = inlined_call_operand.vmem [shape: f32[1,256], index: 2, kind: input, shape index: {}]   ;;  %s603_s3 = inlined_call_operand.hbm [shape: f32[256,128], index: 3, kind: input, shape index: {}]   ;;  %s604_s4 = inlined_call_operand.vmem [shape: f32[1,128], index: 4, kind: input, shape index: {}]   ;;  %s605_s5 = inlined_call_operand.hbm [shape: f32[4,128], index: 5, kind: output, shape index: {}]  }
   0x1   :  { %11 = vsyncpa [#allocation6], 0 }
   0x2   :  { %12 = vsyncpa [#allocation4], 0  ;;  %s507_s18 = smov [#allocation5]   ;;  %s413_s22 = scalar_lea.hbm %s601_s1, 4096 }
   0x3   :  { %s28_s19 = sshll.u32 %s507_s18, 4  ;;  %p414_p0 = scmp.ne.s32.totalorder %s601_s1, %s413_s22  ;;  %s29_s19 = int_to_ptr.vmem [resolvable:$true] %s28_s19 }
   0x4   :  { %p417_p1 = scmp.lt.u32.totalorder %s413_s22, %s601_s1 }
   0x6   :  { %p419_p2 = pnand %p417_p1, %p414_p0 }
   0x8   :  { %422 = shalt.err (!%p419_p2)
}
   0x9   :  { %s423_s27 = scalar_lea.vmem %s29_s19, 4096  ;;  %p428_p4 = scmp.lt.s32.totalorder %s29_s19, %s29_s19 }
   0xa   :  { %p424_p3 = scmp.ne.s32.totalorder %s29_s19, %s423_s27  ;;  %p429_p5 = scmp.lt.s32.totalorder %s423_s27, %s423_s27 }
   0xc   :  { %p430_p6 = por %p429_p5, %p428_p4 }
   0xe   :  { %p431_p7 = pnand %p430_p6, %p424_p3 }
  0x10   :  { %434 = shalt.err (!%p431_p7)
}
  0x11   :  { %s508_s28 = smov 256   ;;  %s509_s29 = smov 16  }
  0x12   :  { %34 = dma.hbm_to_vmem [thread:$0]  %s601_s1, 4096, %s29_s19, [#allocation6], %s508_s28, %s508_s28, %s509_s29  }
  0x13   :  { %s510_s7 = smov [#allocation2]   ;;  %s511_s9 = smov [#allocation7]  }
  0x14   :  { %s19_s8 = sshll.u32 %s510_s7, 4  ;;  %s42_s10 = sshll.u32 %s511_s9, 4  ;;  %s20_s8 = int_to_ptr.vmem [resolvable:$true] %s19_s8  ;;  %s43_s10 = int_to_ptr.vmem [resolvable:$true] %s42_s10 }
  0x15   :  { %s435_s13 = scalar_lea.hbm %s600_s0, 64 }
  0x16   :  { %p436_p8 = scmp.ne.s32.totalorder %s600_s0, %s435_s13  ;;  %p439_p9 = scmp.lt.u32.totalorder %s435_s13, %s600_s0 }
  0x18   :  { %p441_p10 = pnand %p439_p9, %p436_p8 }
  0x1a   :  { %444 = shalt.err (!%p441_p10)
}
  0x1b   :  { %s445_s1 = scalar_lea.vmem %s20_s8, 64  ;;  %p450_p12 = scmp.lt.s32.totalorder %s20_s8, %s20_s8 }
  0x1c   :  { %p446_p11 = scmp.ne.s32.totalorder %s20_s8, %s445_s1  ;;  %p451_p13 = scmp.lt.s32.totalorder %s445_s1, %s445_s1 }
  0x1e   :  { %p452_p0 = por %p451_p13, %p450_p12 }
  0x20   :  { %p453_p1 = pnand %p452_p0, %p446_p11 }
  0x22   :  { %456 = shalt.err (!%p453_p1)
}
  0x23   :  { %22 = dma.hbm_to_vmem [thread:$0]  %s600_s0, 64, %s20_s8, [#allocation3]  }
  0x24   :  { %s457_s22 = scalar_lea.hbm %s603_s3, 4096 }
  0x25   :  { %p458_p2 = scmp.ne.s32.totalorder %s603_s3, %s457_s22  ;;  %p461_p3 = scmp.lt.u32.totalorder %s457_s22, %s603_s3 }
  0x27   :  { %p463_p4 = pnand %p461_p3, %p458_p2 }
  0x29   :  { %466 = shalt.err (!%p463_p4)
}
  0x2a   :  { %s467_s27 = scalar_lea.vmem %s43_s10, 4096  ;;  %p472_p6 = scmp.lt.s32.totalorder %s43_s10, %s43_s10 }
  0x2b   :  { %p468_p5 = scmp.ne.s32.totalorder %s43_s10, %s467_s27  ;;  %p473_p7 = scmp.lt.s32.totalorder %s467_s27, %s467_s27 }
  0x2d   :  { %p474_p8 = por %p473_p7, %p472_p6 }
  0x2f   :  { %p475_p9 = pnand %p474_p8, %p468_p5 }
  0x31   :  { %478 = shalt.err (!%p475_p9)
}
  0x32   :  { %s512_s0 = smov 128   ;;  %s513_s28 = smov 8  }
  0x33   :  { %48 = dma.hbm_to_vmem [thread:$0]  %s603_s3, 4096, %s43_s10, [#allocation6], %s512_s0, %s512_s0, %s513_s28  }
  0x34   :  { %501 = dma.done.wait [#allocation3], 64  }
  0x35   :  { %502 = vsyncadd [#allocation3], 4294967232 }
  0x36   :  { %503 = dma.done.wait [#allocation6], 8192  }
  0x37   :  { %504 = vsyncadd [#allocation6], 4294959104  ;;  %v514_v0 = vmov 0.0   ;;  %v62_v1 = vld [vmem:[#allocation5 + $0x8] sm:$0xff]  ;;  %v64_v2 = vld [vmem:[#allocation5 + $0x18] sm:$0xff]  ;;  %s515_s9 = smov [#allocation8]  }
  0x38   :  { %169 = vmatprep.mubr.f32.mxu0 %v514_v0  ;;  %v61_v3 = vld [vmem:[#allocation5] sm:$0xff]  ;;  %v340_v4 = vpack.c.bf16 %v64_v2, %v62_v1  ;;  %v63_v5 = vld [vmem:[#allocation5 + $0x10] sm:$0xff]  ;;  %v66_v6 = vld [vmem:[#allocation5 + $0x28] sm:$0xff]  ;;  %s294_s10 = sshll.u32 %s515_s9, 4  ;;  %s295_s10 = int_to_ptr.vmem [resolvable:$true] %s294_s10 }
  0x39   :  { %v68_v7 = vld [vmem:[#allocation5 + $0x38] sm:$0xff]  ;;  %v342_v8 = vpack.c.bf16 %v63_v5, %v61_v3  ;;  %v65_v10 = vld [vmem:[#allocation5 + $0x20] sm:$0xff]  ;;  %v67_v11 = vld [vmem:[#allocation5 + $0x30] sm:$0xff]  ;;  %p484_p11 = scmp.lt.s32.totalorder %s295_s10, %s295_s10 }
  0x3a   :  { %v344_v9 = vpack.c.bf16 %v68_v7, %v66_v6  ;;  %v70_v12 = vld [vmem:[#allocation5 + $0x48] sm:$0xff]  ;;  %341 = vmatprep.subr.bf16.mxu0 %v340_v4  ;;  %v72_v13 = vld [vmem:[#allocation5 + $0x58] sm:$0xff]  ;;  %v346_v14 = vpack.c.bf16 %v67_v11, %v65_v10  ;;  %v69_v16 = vld [vmem:[#allocation5 + $0x40] sm:$0xff] }
  0x3b   :  { %343 = vmatpush1.bf16.msra.mxu0 %v342_v8  ;;  %v348_v15 = vpack.c.bf16 %v72_v13, %v70_v12  ;;  %v71_v17 = vld [vmem:[#allocation5 + $0x50] sm:$0xff]  ;;  %v74_v18 = vld [vmem:[#allocation5 + $0x68] sm:$0xff]  ;;  %v76_v19 = vld [vmem:[#allocation5 + $0x78] sm:$0xff] }
  0x3c   :  { %345 = vmatprep.subr.bf16.mxu0 %v344_v9  ;;  %v350_v20 = vpack.c.bf16 %v71_v17, %v69_v16  ;;  %v352_v21 = vpack.c.bf16 %v76_v19, %v74_v18  ;;  %v73_v22 = vld [vmem:[#allocation5 + $0x60] sm:$0xff]  ;;  %v75_v23 = vld [vmem:[#allocation5 + $0x70] sm:$0xff]  ;;  %v78_v24 = vld [vmem:[#allocation5 + $0x88] sm:$0xff] }
  0x3d   :  { %v80_v25 = vld [vmem:[#allocation5 + $0x98] sm:$0xff]  ;;  %v77_v26 = vld [vmem:[#allocation5 + $0x80] sm:$0xff]  ;;  %v79_v27 = vld [vmem:[#allocation5 + $0x90] sm:$0xff]  ;;  %v354_v31 = vpack.c.bf16 %v75_v23, %v73_v22 }
  0x3e   :  { %v194_v28 = vld [vmem:[#allocation7 + $0x80] sm:$0xff]  ;;  %v195_v29 = vld [vmem:[#allocation7 + $0x88] sm:$0xff]  ;;  %v196_v34 = vld [vmem:[#allocation7 + $0x90] sm:$0xff]  ;;  %v356_v36 = vpack.c.bf16 %v80_v25, %v78_v24  ;;  %v358_v46 = vpack.c.bf16 %v79_v27, %v77_v26 }
  0x3f   :  { %347 = vmatpush1.bf16.msra.mxu0 %v346_v14  ;;  %v178_v30 = vld [vmem:[#allocation7] sm:$0xff]  ;;  %v372_v32 = vpack.c.bf16 %v195_v29, %v194_v28  ;;  %v179_v33 = vld [vmem:[#allocation7 + $0x8] sm:$0xff]  ;;  %v197_v35 = vld [vmem:[#allocation7 + $0x98] sm:$0xff] }
  0x40   :  { %349 = vmatprep.subr.bf16.mxu0 %v348_v15  ;;  %v374_v37 = vpack.c.bf16 %v179_v33, %v178_v30  ;;  %v376_v38 = vpack.c.bf16 %v197_v35, %v196_v34  ;;  %v180_v39 = vld [vmem:[#allocation7 + $0x10] sm:$0xff]  ;;  %v181_v40 = vld [vmem:[#allocation7 + $0x18] sm:$0xff]  ;;  %v198_v41 = vld [vmem:[#allocation7 + $0xa0] sm:$0xff]  ;;  %v95_v34 = vlaneseq }
  0x41   :  { %v82_v42 = vld [vmem:[#allocation5 + $0xa8] sm:$0xff]  ;;  %v84_v43 = vld [vmem:[#allocation5 + $0xb8] sm:$0xff]  ;;  %373 = vmatprep.subr.bf16.mxu1 %v372_v32  ;;  %v378_v45 = vpack.c.bf16 %v181_v40, %v180_v39  ;;  %v81_v47 = vld [vmem:[#allocation5 + $0xa0] sm:$0xff] }
  0x42   :  { %v199_v44 = vld [vmem:[#allocation7 + $0xa8] sm:$0xff]  ;;  %375 = vmatpush3.bf16.msra.mxu1 %v374_v37  ;;  %v182_v49 = vld [vmem:[#allocation7 + $0x20] sm:$0xff]  ;;  %v360_v51 = vpack.c.bf16 %v84_v43, %v82_v42  ;;  %v83_v52 = vld [vmem:[#allocation5 + $0xb0] sm:$0xff]  ;;  %v96_v35 = vshrl.u32 %v95_v34, 7 }
  0x43   :  { %351 = vmatpush1.bf16.msra.mxu0 %v350_v20  ;;  %377 = vmatprep.subr.bf16.mxu1 %v376_v38  ;;  %v380_v48 = vpack.c.bf16 %v199_v44, %v198_v41  ;;  %v183_v50 = vld [vmem:[#allocation7 + $0x28] sm:$0xff]  ;;  %v200_v53 = vld [vmem:[#allocation7 + $0xb0] sm:$0xff]  ;;  %v201_v54 = vld [vmem:[#allocation7 + $0xb8] sm:$0xff]  ;;  %v362_v58 = vpack.c.bf16 %v83_v52, %v81_v47 }
  0x44   :  { %353 = vmatprep.subr.bf16.mxu0 %v352_v21  ;;  %v86_v55 = vld [vmem:[#allocation5 + $0xc8] sm:$0xff]  ;;  %v88_v56 = vld [vmem:[#allocation5 + $0xd8] sm:$0xff]  ;;  %v382_v57 = vpack.c.bf16 %v183_v50, %v182_v49  ;;  %v85_v59 = vld [vmem:[#allocation5 + $0xc0] sm:$0xff]  ;;  %v384_v60 = vpack.c.bf16 %v201_v54, %v200_v53  ;;  %v101_v38 = vsub.s32 1, %v96_v35 }
  0x45   :  { %v184_v61 = vld [vmem:[#allocation7 + $0x30] sm:$0xff]  ;;  %v185_v62 = vld [vmem:[#allocation7 + $0x38] sm:$0xff]  ;;  %v364_v63 = vpack.c.bf16 %v88_v56, %v86_v55  ;;  %v202_v1 = vld [vmem:[#allocation7 + $0xc0] sm:$0xff] }
  0x46   :  { %379 = vmatpush3.bf16.msra.mxu1 %v378_v45  ;;  %v87_v0 = vld [vmem:[#allocation5 + $0xd0] sm:$0xff]  ;;  %v203_v2 = vld [vmem:[#allocation7 + $0xc8] sm:$0xff]  ;;  %v92_v4 = vld [vmem:[#allocation5 + $0xf8] sm:$0xff]  ;;  %v386_v5 = vpack.c.bf16 %v185_v62, %v184_v61 }
  0x47   :  { %355 = vmatpush1.bf16.msra.mxu0 %v354_v31  ;;  %381 = vmatprep.subr.bf16.mxu1 %v380_v48  ;;  %v90_v3 = vld [vmem:[#allocation5 + $0xe8] sm:$0xff]  ;;  %v366_v6 = vpack.c.bf16 %v87_v0, %v85_v59  ;;  %v89_v7 = vld [vmem:[#allocation5 + $0xe0] sm:$0xff]  ;;  %v388_v8 = vpack.c.bf16 %v203_v2, %v202_v1  ;;  %v91_v12 = vld [vmem:[#allocation5 + $0xf0] sm:$0xff] }
  0x48   :  { %357 = vmatprep.subr.bf16.mxu0 %v356_v36  ;;  %v186_v9 = vld [vmem:[#allocation7 + $0x40] sm:$0xff]  ;;  %v187_v10 = vld [vmem:[#allocation7 + $0x48] sm:$0xff]  ;;  %v368_v11 = vpack.c.bf16 %v92_v4, %v90_v3  ;;  %v204_v13 = vld [vmem:[#allocation7 + $0xd0] sm:$0xff]  ;;  %v370_v16 = vpack.c.bf16 %v91_v12, %v89_v7  ;;  %v97_v36 = vsub.s32 0, %v96_v35 }
  0x49   :  { %v205_v14 = vld [vmem:[#allocation7 + $0xd8] sm:$0xff]  ;;  %v390_v15 = vpack.c.bf16 %v187_v10, %v186_v9  ;;  %v188_v18 = vld [vmem:[#allocation7 + $0x50] sm:$0xff]  ;;  %v206_v20 = vld [vmem:[#allocation7 + $0xe0] sm:$0xff] }
  0x4a   :  { %383 = vmatpush3.bf16.msra.mxu1 %v382_v57  ;;  %v392_v17 = vpack.c.bf16 %v205_v14, %v204_v13  ;;  %v189_v19 = vld [vmem:[#allocation7 + $0x58] sm:$0xff]  ;;  %v207_v21 = vld [vmem:[#allocation7 + $0xe8] sm:$0xff]  ;;  %v190_v25 = vld [vmem:[#allocation7 + $0x60] sm:$0xff] }
  0x4b   :  { %359 = vmatpush1.bf16.msra.mxu0 %v358_v46  ;;  %385 = vmatprep.subr.bf16.mxu1 %v384_v60  ;;  %v394_v22 = vpack.c.bf16 %v189_v19, %v188_v18  ;;  %v60_v23 = vld [vmem:[#allocation2] sm:$0xf]  ;;  %v396_v24 = vpack.c.bf16 %v207_v21, %v206_v20  ;;  %v191_v26 = vld [vmem:[#allocation7 + $0x68] sm:$0xff]  ;;  %v208_v28 = vld [vmem:[#allocation7 + $0xf0] sm:$0xff] }
  0x4c   :  { %361 = vmatprep.subr.bf16.mxu0 %v360_v51  ;;  %v398_v27 = vpack.c.bf16 %v191_v26, %v190_v25  ;;  %v209_v29 = vld [vmem:[#allocation7 + $0xf8] sm:$0xff]  ;;  %v192_v31 = vld [vmem:[#allocation7 + $0x70] sm:$0xff] }
  0x4d   :  { %v400_v30 = vpack.c.bf16 %v209_v29, %v208_v28  ;;  %v193_v32 = vld [vmem:[#allocation7 + $0x78] sm:$0xff] }
  0x4e   :  { %387 = vmatpush3.bf16.msra.mxu1 %v386_v5  ;;  %v402_v33 = vpack.c.bf16 %v193_v32, %v192_v31  ;;  %v93_v37 = vld [vmem:[%s602_s2] sm:$0x3]  ;;  %s479_s2 = scalar_lea.vmem %s295_s10, 64 }
  0x4f   :  { %363 = vmatpush1.bf16.msra.mxu0 %v362_v58  ;;  %389 = vmatprep.subr.bf16.mxu1 %v388_v8  ;;  %v98_v39 = vrot.slane %v93_v37, %v97_v36  ;;  %v102_v40 = vrot.slane %v93_v37, %v101_v38  ;;  %v304_v48 = vld [vmem:[%s604_s4] ss:$0 sm:$0xff]  ;;  %p480_p10 = scmp.ne.s32.totalorder %s295_s10, %s479_s2  ;;  %p485_p12 = scmp.lt.s32.totalorder %s479_s2, %s479_s2 }
  0x50   :  { %365 = vmatprep.subr.bf16.mxu0 %v364_v63 }
  0x51   :  { %p486_p13 = por %p485_p12, %p484_p11 }
  0x52   :  { %391 = vmatpush3.bf16.msra.mxu1 %v390_v15 }
  0x53   :  { %367 = vmatpush1.bf16.msra.mxu0 %v366_v6  ;;  %393 = vmatprep.subr.bf16.mxu1 %v392_v17  ;;  %p487_p0 = pnand %p486_p13, %p480_p10 }
  0x54   :  { %369 = vmatprep.subr.bf16.mxu0 %v368_v11 }
  0x56   :  { %395 = vmatpush3.bf16.msra.mxu1 %v394_v22 }
  0x57   :  { %371 = vmatpush1.bf16.msra.mxu0 %v370_v16  ;;  %397 = vmatprep.subr.bf16.mxu1 %v396_v24 }
  0x5a   :  { %170 = vmatmul.mubr.f32.vlgmr.msra.gmra.mrb[0].mxu0 %v60_v23  ;;  %399 = vmatpush3.bf16.msra.mxu1 %v398_v27 }
  0x5b   :  { %401 = vmatprep.subr.bf16.mxu1 %v400_v30 }
  0x5e   :  { %403 = vmatpush3.bf16.msra.mxu1 %v402_v33 }
 0x12d   :  { %v171_v41 = vpop.f32.mrb[0].mxu0 }
 0x12e   :  { %v172_v42 = vadd.f32 %v171_v41, %v98_v39  ;;  %v173_v43 = vpop.f32.mrb[1].mxu0 }
 0x12f   :  { %v174_v44 = vadd.f32 %v173_v43, %v102_v40 }
 0x130   :  { %v176_v46 = vmax.f32 %v172_v42, 0.0 }
 0x131   :  { %v177_v45 = vmax.f32 %v174_v44, 0.0 }
 0x133   :  { %281 = vmatprep.mubr.f32.mxu1 %v177_v45 }
 0x134   :  { %282 = vmatmul.mubr.f32.vlgmr.msra.gmra.mrb[0].mxu1 %v176_v46 }
 0x207   :  { %v337_v47 = vpop.f32.mrb[0].mxu1 }
 0x208   :  { %v338_v49 = vpop.f32.mrb[1].mxu1 }
 0x209   :  { %v339_v50 = vadd.f32 %v338_v49, %v337_v47 }
 0x20b   :  { %v284_v51 = vadd.f32 %v339_v50, %v304_v48 }
 0x20d   :  { %287 = vst [vmem:[#allocation8] sm:$0xf] %v284_v51 }
 0x20e   :  { %490 = shalt.err (!%p487_p0)
}
 0x20f   :  { %s491_s13 = scalar_lea.hbm %s605_s5, 64 }
 0x210   :  { %p492_p1 = scmp.ne.s32.totalorder %s605_s5, %s491_s13  ;;  %p495_p2 = scmp.lt.u32.totalorder %s491_s13, %s605_s5 }
 0x212   :  { %p497_p3 = pnand %p495_p2, %p492_p1 }
 0x214   :  { %500 = shalt.err (!%p497_p3)
}
 0x215   :  { %297 = dma.vmem_to_hbm [thread:$0]  %s295_s10, 64, %s605_s5, [#allocation4]  }
 0x216   :  { %505 = dma.done.wait [#allocation4], 64  }
 0x217   :  { %506 = vsyncadd [#allocation4], 4294967232 }
 0x218   :  { %301 = vsyncpa [#allocation3], 1 }
 0x219   :  { %302 = vsyncpa [#allocation6], 1 }
 0x21a   :  { %303 = vsyncpa [#allocation4], 1 }

</bundles_post_ra>
